<compile_context>
chip_gen: v7x
topology: tpu7x:2x2x1
jax: 0.10.0
libtpu: 0.0.40
codegen_flags: <defaults>
</compile_context>

<pallas_src>
import jax
import jax.numpy as jnp
from jax.experimental import pallas as pl
from jax.experimental.pallas import tpu as pltpu

LN_EPS = 1e-5

# Budget for the double-buffered tiles of one grid step (fits comfortably inside
# v7x's 64 MiB physical VMEM and below the 32 MiB scoped default ceilings once
# vmem_limit_bytes is raised).
_VMEM_TILE_BUDGET = 16 * 1024 * 1024
_VMEM_LIMIT_BYTES = 48 * 1024 * 1024


def _sublane(dtype):
    return {4: 8, 2: 16, 1: 32}.get(jnp.dtype(dtype).itemsize, 8)


def _round_up(x, m):
    return ((x + m - 1) // m) * m


def _choose_row_tile(R, bytes_per_row, sub, block_rows):
    """Pick the row-tile size.

    Big enough to amortize the ~0.35us per-grid-step overhead (target ~1-2 MiB
    x tiles), small enough to fit the VMEM budget, and >= 2 grid steps when
    possible so the row axis spans both TensorCores on v7x.
    """
    tm = min(block_rows, _VMEM_TILE_BUDGET // max(bytes_per_row, 1))
    tm = min(tm, _round_up(R, sub))
    tm = max(sub, (tm // sub) * sub)
    if R > sub and pl.cdiv(R, tm) < 2:
        tm = max(sub, _round_up(pl.cdiv(R, 2), sub))
    return tm


# --------------------------------------------------------------------------- #
# Kernels
# --------------------------------------------------------------------------- #
def _layernorm_kernel(x_ref, g_ref, b_ref, o_ref):
    x = x_ref[...].astype(jnp.float32)            # (TM, D)
    g = g_ref[...].astype(jnp.float32)            # (1, D) broadcasts over rows
    b = b_ref[...].astype(jnp.float32)            # (1, D)

    mean = jnp.mean(x, axis=-1, keepdims=True)    # (TM, 1)
    xc = x - mean
    var = jnp.mean(xc * xc, axis=-1, keepdims=True)   # centered (robust) variance
    inv_std = jax.lax.rsqrt(var + LN_EPS)         # EUP rsqrt

    o_ref[...] = (xc * inv_std * g + b).astype(o_ref.dtype)


def _prenorm_linear_kernel(x_ref, g_ref, b_ref, w_ref, pb_ref, o_ref):
    x = x_ref[...].astype(jnp.float32)            # (TM, D)
    g = g_ref[...].astype(jnp.float32)            # (1, D)
    b = b_ref[...].astype(jnp.float32)            # (1, D)

    mean = jnp.mean(x, axis=-1, keepdims=True)
    xc = x - mean
    var = jnp.mean(xc * xc, axis=-1, keepdims=True)
    inv_std = jax.lax.rsqrt(var + LN_EPS)
    y = xc * inv_std * g + b                      # (TM, D) normalized

    w = w_ref[...].astype(jnp.float32)            # (D, N) resident
    out = jnp.dot(y, w, preferred_element_type=jnp.float32)   # MXU
    out = out + pb_ref[...].astype(jnp.float32)   # (1, N) broadcast
    o_ref[...] = out.astype(o_ref.dtype)


# --------------------------------------------------------------------------- #
# Wrappers
# --------------------------------------------------------------------------- #
def layer_norm(x, gamma, beta, *, block_rows=2048):
    """LayerNorm over the last dim of x (any leading shape), PyTorch semantics."""
    orig_shape = x.shape
    D = orig_shape[-1]
    x2 = x.reshape(-1, D)
    R = x2.shape[0]

    sub = _sublane(x.dtype)
    in_b = jnp.dtype(x.dtype).itemsize
    # double-buffered x tile + double-buffered out tile + in-kernel f32 temps
    bytes_per_row = D * (2 * in_b + 2 * in_b + 3 * 4)
    tm = _choose_row_tile(R, bytes_per_row, sub, block_rows)
    grid = (pl.cdiv(R, tm),)   # ragged last block: partial stores are masked

    g2 = gamma.reshape(1, D)
    b2 = beta.reshape(1, D)

    out = pl.pallas_call(
        _layernorm_kernel,
        out_shape=jax.ShapeDtypeStruct((R, D), x.dtype),
        grid=grid,
        in_specs=[
            pl.BlockSpec((tm, D), lambda i: (i, 0)),   # x row tile (pipelined)
            pl.BlockSpec((1, D), lambda i: (0, 0)),    # gamma (resident)
            pl.BlockSpec((1, D), lambda i: (0, 0)),    # beta  (resident)
        ],
        out_specs=pl.BlockSpec((tm, D), lambda i: (i, 0)),
        compiler_params=pltpu.CompilerParams(
            dimension_semantics=("parallel",),
            vmem_limit_bytes=_VMEM_LIMIT_BYTES),
    )(x2, g2, b2)
    return out.reshape(orig_shape)


def pre_norm_linear(x, gamma, beta, w, bias, *, block_rows=2048):
    """Fused PreNorm + linear projection: LayerNorm(x) @ w + bias.

    Use this path when the wrapped `fn` begins with a Linear (Graphormer's
    Attention QKV / FeedForward first projection).
    """
    # TODO(synk): for very large D (>~2048) the resident W should be K-tiled with
    # an f32 VMEM accumulator instead of being held whole in VMEM.
    orig_shape = x.shape
    D = orig_shape[-1]
    N = w.shape[1]
    x2 = x.reshape(-1, D)
    R = x2.shape[0]

    sub = _sublane(x.dtype)
    in_b = jnp.dtype(x.dtype).itemsize
    bytes_per_row = 2 * D * in_b + 2 * N * in_b + 4 * 4 * max(D, N)
    tm = _choose_row_tile(R, bytes_per_row, sub, block_rows)
    grid = (pl.cdiv(R, tm),)

    g2 = gamma.reshape(1, D)
    b2 = beta.reshape(1, D)
    pb2 = bias.reshape(1, N)

    out = pl.pallas_call(
        _prenorm_linear_kernel,
        out_shape=jax.ShapeDtypeStruct((R, N), x.dtype),
        grid=grid,
        in_specs=[
            pl.BlockSpec((tm, D), lambda i: (i, 0)),   # x row tile (pipelined)
            pl.BlockSpec((1, D), lambda i: (0, 0)),    # gamma (resident)
            pl.BlockSpec((1, D), lambda i: (0, 0)),    # beta  (resident)
            pl.BlockSpec((D, N), lambda i: (0, 0)),    # W (resident)
            pl.BlockSpec((1, N), lambda i: (0, 0)),    # projection bias (resident)
        ],
        out_specs=pl.BlockSpec((tm, N), lambda i: (i, 0)),
        compiler_params=pltpu.CompilerParams(
            dimension_semantics=("parallel",),
            vmem_limit_bytes=_VMEM_LIMIT_BYTES),
    )(x2, g2, b2, w, pb2)
    return out.reshape(orig_shape[:-1] + (N,))


def pre_norm(x, gamma, beta, fn, **kwargs):
    """PreNorm.forward: fn(LayerNorm(x), **kwargs) — generic fallback path."""
    # TODO(synk): `fn` is an arbitrary nn.Module in the original code; it cannot
    # be fused generically into the kernel, so it is applied as plain JAX here.
    # When fn's leading op is a Linear, prefer pre_norm_linear() (fused).
    return fn(layer_norm(x, gamma, beta), **kwargs)


if __name__ == "__main__":
    # Shapes implied by Graphormer usage: (batch, seq, dim); dim lane-dense (128).
    B, S, D = 2, 16, 128

    key = jax.random.PRNGKey(0)
    kx, kw, kb = jax.random.split(key, 3)

    x = jax.random.normal(kx, (B, S, D), dtype=jnp.float32)

    # PyTorch nn.LayerNorm default affine init: weight=1, bias=0.
    gamma = jnp.ones((D,), dtype=jnp.float32)
    beta = jnp.zeros((D,), dtype=jnp.float32)

    # Example `fn` (the wrapped module in Graphormer is Attention / FeedForward);
    # here: a deterministic linear projection, PyTorch-style uniform init.
    bound = 1.0 / (D ** 0.5)
    W = jax.random.uniform(kw, (D, D), dtype=jnp.float32, minval=-bound, maxval=bound)
    b = jax.random.uniform(kb, (D,), dtype=jnp.float32, minval=-bound, maxval=bound)
    fn = lambda y: y @ W + b

    # Fused PreNorm + linear path (preferred when fn starts with a Linear).
    out_fused = pre_norm_linear(x, gamma, beta, W, b)
    # Generic path: standalone LayerNorm kernel + fn as plain JAX.
    out_generic = pre_norm(x, gamma, beta, fn)
    jax.block_until_ready((out_fused, out_generic))

    assert out_fused.shape == (B, S, D)
    assert out_generic.shape == (B, S, D)

    # Reference check against pure-JAX LayerNorm + fn.
    mean = jnp.mean(x, axis=-1, keepdims=True)
    var = jnp.mean((x - mean) ** 2, axis=-1, keepdims=True)
    ref = fn((x - mean) / jnp.sqrt(var + LN_EPS) * gamma + beta)
    assert jnp.allclose(out_fused, ref, atol=1e-4, rtol=1e-4), "fused mismatch"
    assert jnp.allclose(out_generic, ref, atol=1e-4, rtol=1e-4), "generic mismatch"

    print("KERNEL_OK")
</pallas_src>

<mosaic_0001>
module attributes {stable_mosaic.version = 11 : i64} {
  func.func @_prenorm_linear_kernel(%arg0: i32, %arg1: memref<16x128xf32, #tpu.memory_space<vmem>>, %arg2: memref<1x128xf32, #tpu.memory_space<vmem>>, %arg3: memref<1x128xf32, #tpu.memory_space<vmem>>, %arg4: memref<128x128xf32, #tpu.memory_space<vmem>>, %arg5: memref<1x128xf32, #tpu.memory_space<vmem>>, %arg6: memref<16x128xf32, #tpu.memory_space<vmem>>) attributes {dimension_semantics = [#tpu.dimension_semantics<parallel>], iteration_bounds = array<i64: 2>, scalar_prefetch = 0 : i64, scratch_operands = 0 : i64, tpu.core_type = #tpu.core_type<tc>, window_params = [{transform_indices = @transform_0, window_bounds = array<i64: 16, 128>}, {pipeline_mode = #tpu.pipeline_mode<synchronous>, transform_indices = @transform_1, window_bounds = array<i64: 1, 128>}, {pipeline_mode = #tpu.pipeline_mode<synchronous>, transform_indices = @transform_2, window_bounds = array<i64: 1, 128>}, {pipeline_mode = #tpu.pipeline_mode<synchronous>, transform_indices = @transform_3, window_bounds = array<i64: 128, 128>}, {pipeline_mode = #tpu.pipeline_mode<synchronous>, transform_indices = @transform_4, window_bounds = array<i64: 1, 128>}, {transform_indices = @transform_5, window_bounds = array<i64: 16, 128>}]} {
    %c0 = arith.constant 0 : index
    %c0_0 = arith.constant 0 : index
    %0 = vector.load %arg1[%c0, %c0_0] : memref<16x128xf32, #tpu.memory_space<vmem>>, vector<16x128xf32>
    %c0_1 = arith.constant 0 : index
    %c0_2 = arith.constant 0 : index
    %1 = vector.load %arg2[%c0_1, %c0_2] : memref<1x128xf32, #tpu.memory_space<vmem>>, vector<1x128xf32>
    %c0_3 = arith.constant 0 : index
    %c0_4 = arith.constant 0 : index
    %2 = vector.load %arg3[%c0_3, %c0_4] : memref<1x128xf32, #tpu.memory_space<vmem>>, vector<1x128xf32>
    %cst = arith.constant dense<0.000000e+00> : vector<16xf32>
    %3 = vector.multi_reduction <add>, %0, %cst [1] : vector<16x128xf32> to vector<16xf32>
    %4 = vector.shape_cast %3 : vector<16xf32> to vector<16x1xf32>
    %cst_5 = arith.constant 1.280000e+02 : f32
    %5 = vector.broadcast %cst_5 : f32 to vector<16x1xf32>
    %6 = arith.divf %4, %5 : vector<16x1xf32>
    %7 = vector.broadcast %6 : vector<16x1xf32> to vector<16x128xf32>
    %8 = arith.subf %0, %7 : vector<16x128xf32>
    %9 = arith.mulf %8, %8 : vector<16x128xf32>
    %cst_6 = arith.constant dense<0.000000e+00> : vector<16xf32>
    %10 = vector.multi_reduction <add>, %9, %cst_6 [1] : vector<16x128xf32> to vector<16xf32>
    %11 = vector.shape_cast %10 : vector<16xf32> to vector<16x1xf32>
    %cst_7 = arith.constant 1.280000e+02 : f32
    %12 = vector.broadcast %cst_7 : f32 to vector<16x1xf32>
    %13 = arith.divf %11, %12 : vector<16x1xf32>
    %cst_8 = arith.constant 9.99999974E-6 : f32
    %14 = vector.broadcast %cst_8 : f32 to vector<16x1xf32>
    %15 = arith.addf %13, %14 : vector<16x1xf32>
    %16 = math.rsqrt %15 : vector<16x1xf32>
    %17 = vector.broadcast %16 : vector<16x1xf32> to vector<16x128xf32>
    %18 = arith.mulf %8, %17 : vector<16x128xf32>
    %19 = vector.broadcast %1 : vector<1x128xf32> to vector<16x128xf32>
    %20 = arith.mulf %18, %19 : vector<16x128xf32>
    %21 = vector.broadcast %2 : vector<1x128xf32> to vector<16x128xf32>
    %22 = arith.addf %20, %21 : vector<16x128xf32>
    %c0_9 = arith.constant 0 : index
    %c0_10 = arith.constant 0 : index
    %23 = vector.load %arg4[%c0_9, %c0_10] : memref<128x128xf32, #tpu.memory_space<vmem>>, vector<128x128xf32>
    %cst_11 = arith.constant dense<0.000000e+00> : vector<16x128xf32>
    %24 = tpu.matmul %22, %23, %cst_11 {dimension_numbers = #tpu.dot_dimension_numbers<[1], [0], [0], [1], [0, 0, 1, 1], [], []>} : vector<16x128xf32>, vector<128x128xf32>, vector<16x128xf32> -> vector<16x128xf32>
    %c0_12 = arith.constant 0 : index
    %c0_13 = arith.constant 0 : index
    %25 = vector.load %arg5[%c0_12, %c0_13] : memref<1x128xf32, #tpu.memory_space<vmem>>, vector<1x128xf32>
    %26 = vector.broadcast %25 : vector<1x128xf32> to vector<16x128xf32>
    %27 = arith.addf %24, %26 : vector<16x128xf32>
    %c0_14 = arith.constant 0 : index
    %c0_15 = arith.constant 0 : index
    %28 = vector.load %arg6[%c0_14, %c0_15] : memref<16x128xf32, #tpu.memory_space<vmem>>, vector<16x128xf32>
    tpu.vector_store %arg6[%c0_14, %c0_15], %27 {strides = array<i32>} : memref<16x128xf32, #tpu.memory_space<vmem>>, vector<16x128xf32>,
    return
  }
  func.func @transform_0(%arg0: i32) -> (i32, i32) {
    %c0_i32 = arith.constant 0 : i32
    %c0_i32_0 = arith.constant 0 : i32
    return %arg0, %c0_i32 : i32, i32
  }
  func.func @transform_1(%arg0: i32) -> (i32, i32) {
    %c0_i32 = arith.constant 0 : i32
    %c0_i32_0 = arith.constant 0 : i32
    %c0_i32_1 = arith.constant 0 : i32
    return %c0_i32, %c0_i32_0 : i32, i32
  }
  func.func @transform_2(%arg0: i32) -> (i32, i32) {
    %c0_i32 = arith.constant 0 : i32
    %c0_i32_0 = arith.constant 0 : i32
    %c0_i32_1 = arith.constant 0 : i32
    return %c0_i32, %c0_i32_0 : i32, i32
  }
  func.func @transform_3(%arg0: i32) -> (i32, i32) {
    %c0_i32 = arith.constant 0 : i32
    %c0_i32_0 = arith.constant 0 : i32
    %c0_i32_1 = arith.constant 0 : i32
    return %c0_i32, %c0_i32_0 : i32, i32
  }
  func.func @transform_4(%arg0: i32) -> (i32, i32) {
    %c0_i32 = arith.constant 0 : i32
    %c0_i32_0 = arith.constant 0 : i32
    %c0_i32_1 = arith.constant 0 : i32
    return %c0_i32, %c0_i32_0 : i32, i32
  }
  func.func @transform_5(%arg0: i32) -> (i32, i32) {
    %c0_i32 = arith.constant 0 : i32
    %c0_i32_0 = arith.constant 0 : i32
    return %arg0, %c0_i32 : i32, i32
  }
}

</mosaic_0001>

<bundles_post_ra>
// kernel: tpu_custom_call.1
= control target key start
LH: loop header
LB: loop body
LE: loop exit
PB: predicated region body
PF: predicated region fallthrough
CT: control target
= control target key end

     0   :  { %10 = vsyncpa [#allocation3], 0  ;;  %s1058_s0 = inlined_call_operand.hbm [shape: f32[32,128], index: 0, kind: input, shape index: {}]   ;;  %s1059_s1 = inlined_call_operand.vmem [shape: f32[1,128], index: 1, kind: input, shape index: {}]   ;;  %s1060_s2 = inlined_call_operand.vmem [shape: f32[1,128], index: 2, kind: input, shape index: {}]   ;;  %s1061_s3 = inlined_call_operand.hbm [shape: f32[128,128], index: 3, kind: input, shape index: {}]   ;;  %s1062_s4 = inlined_call_operand.vmem [shape: f32[1,128], index: 4, kind: input, shape index: {}]   ;;  %s1063_s5 = inlined_call_operand.hbm [shape: f32[32,128], index: 5, kind: output, shape index: {}]  }
   0x1   :  { %12 = vsyncpa [#allocation3 + $0x1], 0 }
   0x2   :  { %13 = vsyncpa [#allocation6], 0 }
   0x3   :  { %14 = vsyncpa [#allocation4], 0 }
   0x4   :  { %16 = vsyncpa [#allocation4 + $0x1], 0  ;;  %s838_s18 = smov 0   ;;  %s840_s19 = smov 0  }
   0x5   :  { %s842_s20 = smov 0   ;;  %s844_s21 = smov 0  }
   0x6 LB: > { %s859_s22 = sadd.s32 4294967295, %s799_s21   ;;  %s500_s23 = sadd.s32 4294967294, %s799_s21   ;;  %s799_s21 = sphi %s844_s21, %s1083_s21   ;;  %s795_s20 = sphi %s842_s20, %s1082_s20   ;;  %s791_s19 = sphi %s840_s19, %s1081_s19   ;;  %s787_s18 = sphi %s838_s18, %s1080_s18  }
   0x7   : > { %p42_p0 = scmp.ne.s32.totalorder %s791_s19, %s787_s18  ;;  %p1064_p1 = scmp.eq.s32.totalorder %s859_s22, 0 }
   0x8   : > { %p156_p3 = scmp.eq.s32.totalorder %s500_s23, 1  ;;  %p501_p5 = scmp.ge.s32.totalorder %s799_s21, 1 }
   0x9   : > { %p868_p4 = por %p1064_p1, %p42_p0  ;;  %p163_p7 = scmp.lt.s32.totalorder %s799_s21, 3 }
   0xa   : > { %p873_p6 = por %p156_p3, %p42_p0  ;;  %s801_s27 = smov [#allocation5]  }
   0xb   : > { %s1067_s24 = scalar_select %p868_p4, 1, 0 }
   0xc   : > { %s1068_s25 = scalar_select %p873_p6, 1, 0 }
   0xd   : > { %p878_p8 = pnand %p501_p5, %p163_p7  ;;  %s181_s28 = sshll.u32 %s801_s27, 4  ;;  %s882_s28 = int_to_ptr.vmem [resolvable:$true] %s181_s28 }
   0xe   : > { %s894_s30 = sadd.s32 1, %s799_s21   ;;  %s29_s6 = sadd.s32 1, %s795_s20 }
   0xf   : > { %s1069_s26 = scalar_select %p878_p8, 1, 0 }
  0x10   : > { %p614_p9 = pneg %p878_p8  ;;  %s26_s7 = ssub.s32 %s799_s21, %s894_s30 }
  0x11   : > { %s671_s10 = scalar_lea.hbm %s1061_s3, 2048 }
  0x12   : > { %p889_p11 = pnand %p614_p9, %p1064_p1  ;;  %p672_p12 = scmp.ne.s32.totalorder %s1061_s3, %s671_s10 }
  0x13   : > { %p678_p5 = scmp.lt.u32.totalorder %s671_s10, %s1061_s3 }
  0x14   : > { %p673_p13 = pneg %p889_p11 }
  0x16   : > { %p674_p0 = pnand %p673_p13, %p672_p12 }
  0x18   : > { %p675_p3 = pneg %p674_p0 }
  0x1a   : > { %p680_p7 = pnand %p678_p5, %p675_p3 }
  0x1c   : > { %683 = shalt.err (!%p680_p7)
}
  0x1d   : > { %s684_s15 = scalar_lea.vmem %s882_s28, 2048  ;;  %p692_p2 = scmp.lt.s32.totalorder %s882_s28, %s882_s28 }
  0x1e   : > { %p685_p9 = scmp.ne.s32.totalorder %s882_s28, %s684_s15  ;;  %p693_p6 = scmp.lt.s32.totalorder %s684_s15, %s684_s15 }
  0x20   : > { %p687_p10 = pnand %p685_p9, %p673_p13  ;;  %p694_p4 = por %p693_p6, %p692_p2 }
  0x22   : > { %p688_p1 = pneg %p687_p10 }
  0x24   : > { %p695_p8 = pnand %p694_p4, %p688_p1 }
  0x26   : > { %698 = shalt.err (!%p695_p8)
}
  0x27   : > { %s802_s16 = smov 128   ;;  %s803_s17 = smov 8  }
  0x28   : > { %617 = dma.hbm_to_vmem [thread:$0]  (!%p889_p11), %s1061_s3, 2048, %s882_s28, [#allocation6], %s802_s16, %s802_s16, %s803_s17  }
  0x29   : > { %p27_p1 = scmp.eq.s32.totalorder %s26_s7, 0  ;;  %p36_p2 = scmp.ne.s32.totalorder %s795_s20, %s791_s19 }
  0x2a   : > { %p37_p4 = scmp.eq.s32.totalorder %s799_s21, 0  ;;  %p627_p6 = scmp.lt.s32.totalorder %s799_s21, 2 }
  0x2b   : > { %s928_s8 = scalar_select %p27_p1, %s795_s20, %s29_s6  }
  0x2c   : > { %p38_p8 = por %p37_p4, %p36_p2  ;;  %p1071_p10 = scmp.eq.s32.totalorder %s859_s22, 1 }
  0x2d   : > { %s198_s29 = sand.u32 1, %s795_s20   ;;  %s519_s10 = sshll.u32 %s799_s21, 8 }
  0x2e   : > { %p932_p12 = por %p1071_p10, %p36_p2  ;;  %s504_s11 = sshll.u32 %s198_s29, 4 }
  0x2f   : > { %s941_s14 = scalar_lea.hbm %s1058_s0, %s519_s10  ;;  %s202_s28 = scalar_lea.vmem [#allocation2], %s504_s11 }
  0x30   : > { %s209_s6 = sshll.u32 %s202_s28, 4  ;;  %p943_p11 = pnand %p627_p6, %p38_p8  ;;  %s947_s6 = int_to_ptr.vmem [resolvable:$true] %s209_s6 }
  0x31   : > { %s949_s15 = scalar_lea.sflag [#allocation3], %s198_s29  ;;  %s699_s23 = scalar_lea.hbm %s941_s14, 256 }
  0x32   : > { %p700_p13 = scmp.ne.s32.totalorder %s941_s14, %s699_s23  ;;  %p701_p0 = pneg %p943_p11 }
  0x33   : > { %s704_s11 = scalar_lea.hbm %s1058_s0, 512  ;;  %p705_p7 = scmp.lt.u32.totalorder %s941_s14, %s1058_s0 }
  0x34   : > { %p702_p3 = pnand %p701_p0, %p700_p13  ;;  %p706_p9 = scmp.lt.u32.totalorder %s704_s11, %s699_s23 }
  0x35   : > { %p708_p2 = scmp.lt.u32.totalorder %s699_s23, %s941_s14 }
  0x36   : > { %p703_p5 = pneg %p702_p3  ;;  %p707_p1 = por %p706_p9, %p705_p7 }
  0x38   : > { %p709_p4 = por %p708_p2, %p707_p1 }
  0x3a   : > { %p710_p6 = pnand %p709_p4, %p703_p5 }
  0x3c   : > { %713 = shalt.err (!%p710_p6)
}
  0x3d   : > { %s714_s29 = scalar_lea.vmem %s947_s6, 256  ;;  %s804_s28 = smov [#allocation2]  }
  0x3e   : > { %p715_p8 = scmp.ne.s32.totalorder %s947_s6, %s714_s29  ;;  %s719_s27 = sshll.u32 %s804_s28, 4  ;;  %s720_s27 = int_to_ptr.vmem [resolvable:$false] %s719_s27 }
  0x3f   : > { %s721_s10 = scalar_lea.vmem %s720_s27, 512  ;;  %p722_p3 = scmp.lt.s32.totalorder %s947_s6, %s720_s27 }
  0x40   : > { %p717_p10 = pnand %p715_p8, %p701_p0  ;;  %p723_p7 = scmp.lt.s32.totalorder %s721_s10, %s714_s29 }
  0x42   : > { %p718_p13 = pneg %p717_p10  ;;  %p724_p9 = por %p723_p7, %p722_p3 }
  0x44   : > { %p725_p1 = pnand %p724_p9, %p718_p13 }
  0x46   : > { %728 = shalt.err (!%p725_p1)
}
  0x47   : > { %621 = dma.hbm_to_vmem [thread:$0]  (!%p943_p11), %s941_s14, 256, %s947_s6, %s949_s15, %s802_s16, %s802_s16, %s803_s17  }
  0x48   : > { %p1074_p0 = scmp.ne.s32.totalorder %s1069_s26, 0 }
  0x49   : > { %s983_s23 = sand.u32 (!%p1074_p0), 1, %s791_s19   ;;  %p1075_p5 = scmp.ne.s32.totalorder (!%p1074_p0), %s1067_s24, 0 }
  0x4a   : > { %221 = sbr.rel (%p1074_p0) target bundleno = 631 (0x277), region = 40  ;;  %s508_s11 = sshll.u32 (!%p1074_p0), %s983_s23, 4 }
  0x4b   : > { %s224_s12 = scalar_lea.sflag (!%p1074_p0), [#allocation3], %s983_s23  ;;  %s227_s7 = scalar_lea.vmem (!%p1074_p0), [#allocation2], %s508_s11 }
  0x51   : > { %774 = dma.done.wait (%p1075_p5), %s224_s12, 256  }
  0x52   : > { %776 = vsyncadd (%p1075_p5), %s224_s12, 4294967040  ;;  %p1076_p11 = scmp.eq.s32.totalorder %s859_s22, 0 }
  0x54   : > { %778 = dma.done.wait (%p1076_p11), [#allocation6], 2048   ;;  %p1077_p2 = pmov %p1076_p11 }
  0x55   : > { %v260_v0 = vld [vmem:[%s227_s7] sm:$0xff]  ;;  %v261_v1 = vld [vmem:[%s227_s7 + $0x8] sm:$0xff]  ;;  %s257_s14 = scalar_lea.vmem [#allocation7], %s508_s11  ;;  %s520_s29 = sshll.u32 %s859_s22, 8 }
  0x56   : > { %780 = vsyncadd (%p1077_p2), [#allocation6], 4294965248  ;;  %264 = vadd.xlane.f32.xlu0 %v260_v0  ;;  %v303_v2 = vld [vmem:[#allocation5] sm:$0xff]  ;;  %v304_v3 = vld [vmem:[#allocation5 + $0x8] sm:$0xff]  ;;  %s417_s6 = sshll.u32 %s257_s14, 4  ;;  %s1014_s10 = scalar_lea.hbm %s1063_s5, %s520_s29  ;;  %s1009_s6 = int_to_ptr.vmem [resolvable:$true] %s417_s6 }
  0x57   : > { %v305_v4 = vld [vmem:[#allocation5 + $0x10] sm:$0xff]  ;;  %v574_v5 = vpack.c.bf16 %v304_v3, %v303_v2  ;;  %v306_v6 = vld [vmem:[#allocation5 + $0x18] sm:$0xff]  ;;  %v307_v16 = vld [vmem:[#allocation5 + $0x20] sm:$0xff]  ;;  %s404_s11 = scalar_lea.sflag [#allocation4], %s983_s23  ;;  %s729_s12 = scalar_lea.vmem %s1009_s6, 256 }
  0x58   : > { %v578_v7 = vpack.c.bf16 %v306_v6, %v305_v4  ;;  %v308_v17 = vld [vmem:[#allocation5 + $0x28] sm:$0xff]  ;;  %v309_v19 = vld [vmem:[#allocation5 + $0x30] sm:$0xff]  ;;  %v310_v20 = vld [vmem:[#allocation5 + $0x38] sm:$0xff]  ;;  %p730_p4 = scmp.ne.s32.totalorder %s1009_s6, %s729_s12  ;;  %s805_s22 = smov [#allocation7]  }
  0x59   : > { %575 = vmatprep.subr.bf16.mxu0 %v574_v5  ;;  %v582_v18 = vpack.c.bf16 %v308_v17, %v307_v16  ;;  %v586_v21 = vpack.c.bf16 %v310_v20, %v309_v19  ;;  %v311_v22 = vld [vmem:[#allocation5 + $0x40] sm:$0xff]  ;;  %v312_v23 = vld [vmem:[#allocation5 + $0x48] sm:$0xff]  ;;  %v313_v25 = vld [vmem:[#allocation5 + $0x50] sm:$0xff]  ;;  %s733_s7 = sshll.u32 %s805_s22, 4  ;;  %s734_s7 = int_to_ptr.vmem [resolvable:$false] %s733_s7 }
  0x5a   : > { %266 = vadd.xlane.f32.xlu0 %v261_v1  ;;  %577 = vmatpush3.bf16.msra.mxu0 %v574_v5  ;;  %v590_v24 = vpack.c.bf16 %v312_v23, %v311_v22  ;;  %v314_v26 = vld [vmem:[#allocation5 + $0x58] sm:$0xff]  ;;  %v315_v27 = vld [vmem:[#allocation5 + $0x60] sm:$0xff]  ;;  %v316_v29 = vld [vmem:[#allocation5 + $0x68] sm:$0xff]  ;;  %p731_p6 = pnand %p730_p4, %p932_p12  ;;  %s735_s24 = scalar_lea.vmem %s734_s7, 512 }
  0x5b   : > { %579 = vmatprep.subr.bf16.mxu0 %v578_v7  ;;  %v594_v28 = vpack.c.bf16 %v314_v26, %v313_v25  ;;  %v598_v30 = vpack.c.bf16 %v316_v29, %v315_v27  ;;  %v317_v31 = vld [vmem:[#allocation5 + $0x70] sm:$0xff]  ;;  %v318_v32 = vld [vmem:[#allocation5 + $0x78] sm:$0xff]  ;;  %v511_v41 = vld [vmem:[%s1059_s1] ss:$0 sm:$0xff]  ;;  %p736_p10 = scmp.lt.s32.totalorder %s1009_s6, %s734_s7  ;;  %p737_p13 = scmp.lt.s32.totalorder %s735_s24, %s729_s12 }
  0x5c   : > { %v602_v33 = vpack.c.bf16 %v318_v32, %v317_v31  ;;  %v512_v43 = vld [vmem:[%s1060_s2] ss:$0 sm:$0xff]  ;;  %p732_p8 = pneg %p731_p6 }
  0x5d   : > { %v513_v50 = vld [vmem:[%s1062_s4] ss:$0 sm:$0xff]  ;;  %p738_p3 = por %p737_p13, %p736_p10 }
  0x5e   : > { %581 = vmatpush3.bf16.msra.mxu0 %v578_v7 }
  0x5f   : > { %583 = vmatprep.subr.bf16.mxu0 %v582_v18  ;;  %p739_p7 = pnand %p738_p3, %p732_p8 }
  0x62   : > { %585 = vmatpush3.bf16.msra.mxu0 %v582_v18 }
  0x63   : > { %587 = vmatprep.subr.bf16.mxu0 %v586_v21 }
  0x66   : > { %589 = vmatpush3.bf16.msra.mxu0 %v586_v21 }
  0x67   : > { %591 = vmatprep.subr.bf16.mxu0 %v590_v24 }
  0x6a   : > { %593 = vmatpush3.bf16.msra.mxu0 %v590_v24 }
  0x6b   : > { %595 = vmatprep.subr.bf16.mxu0 %v594_v28 }
  0x6e   : > { %597 = vmatpush3.bf16.msra.mxu0 %v594_v28 }
  0x6f   : > { %599 = vmatprep.subr.bf16.mxu0 %v598_v30 }
  0x72   : > { %601 = vmatpush3.bf16.msra.mxu0 %v598_v30 }
  0x73   : > { %603 = vmatprep.subr.bf16.mxu0 %v602_v33 }
  0x76   : > { %605 = vmatpush3.bf16.msra.mxu0 %v602_v33 }
  0xe3   : > { %v265_v8 = vpop.xlane.xlu0 %264 }
  0xe4   : > { %v269_v9 = vmul.f32 0.0078125, %v265_v8 }
  0xe6   : > { %v271_v10 = vsub.f32 %v260_v0, %v269_v9 }
  0xe7   : > { %v267_v11 = vpop.xlane.xlu0 %266 }
  0xe8   : > { %v270_v12 = vmul.f32 0.0078125, %v267_v11  ;;  %v273_v13 = vmul.f32 %v271_v10, %v271_v10 }
  0xea   : > { %v272_v14 = vsub.f32 %v261_v1, %v270_v12  ;;  %275 = vadd.xlane.f32.xlu1 %v273_v13 }
  0xec   : > { %v274_v15 = vmul.f32 %v272_v14, %v272_v14 }
  0xee   : > { %277 = vadd.xlane.f32.xlu1 %v274_v15 }
 0x177   : > { %v276_v34 = vpop.xlane.xlu1 %275 }
 0x178   : > { %v279_v35 = vmul.f32 0.0078125, %v276_v34 }
 0x17a   : > { %v281_v36 = vadd.f32 1e-05, %v279_v35 }
 0x17b   : > { %v278_v37 = vpop.xlane.xlu1 %277 }
 0x17c   : > { %667 = vrsqrt.f32 %v281_v36  ;;  %v280_v38 = vmul.f32 0.0078125, %v278_v37 }
 0x17e   : > { %v282_v39 = vadd.f32 1e-05, %v280_v38 }
 0x180   : > { %669 = vrsqrt.f32 %v282_v39 }
 0x186   : > { %v668_v40 = vpop.eup %667 }
 0x187   : > { %v285_v42 = vmul.f32 %v668_v40, %v271_v10 }
 0x189   : > { %v293_v44 = vmul.f32 %v511_v41, %v285_v42 }
 0x18a   : > { %v670_v45 = vpop.eup %669 }
 0x18b   : > { %v286_v46 = vmul.f32 %v670_v45, %v272_v14  ;;  %v301_v47 = vadd.f32 %v512_v43, %v293_v44 }
 0x18d   : > { %v294_v48 = vmul.f32 %v511_v41, %v286_v46  ;;  %571 = vmatprep.mubr.f32.mxu0 %v301_v47 }
 0x18f   : > { %v302_v49 = vadd.f32 %v512_v43, %v294_v48 }
 0x191   : > { %572 = vmatmul.mubr.f32.vlgmr.msra.gmra.mrb[0].mxu0 %v302_v49 }
 0x264   : > { %v573_v51 = vpop.f32.mrb[0].mxu0 }
 0x265   : > { %v398_v52 = vadd.f32 %v573_v51, %v513_v50  ;;  %v392_v53 = vpop.f32.mrb[1].mxu0 }
 0x266   : > { %v393_v54 = vadd.f32 %v513_v50, %v392_v53 }
 0x267   : > { %402 = vst [vmem:[%s257_s14 + $0x8] sm:$0xff] %v398_v52 }
 0x268   : > { %401 = vst [vmem:[%s257_s14] sm:$0xff] %v393_v54 }
 0x269   : > { %742 = shalt.err (!%p739_p7)
}
 0x26a   : > { %s743_s26 = scalar_lea.hbm %s1014_s10, 256  ;;  %s747_s14 = scalar_lea.hbm %s1063_s5, 512 }
 0x26b   : > { %p744_p9 = scmp.ne.s32.totalorder %s1014_s10, %s743_s26  ;;  %p748_p5 = scmp.lt.u32.totalorder %s1014_s10, %s1063_s5 }
 0x26c   : > { %p749_p11 = scmp.lt.u32.totalorder %s747_s14, %s743_s26  ;;  %p751_p4 = scmp.lt.u32.totalorder %s743_s26, %s1014_s10 }
 0x26d   : > { %p745_p1 = pnand %p744_p9, %p932_p12 }
 0x26e   : > { %p750_p2 = por %p749_p11, %p748_p5 }
 0x26f   : > { %p746_p0 = pneg %p745_p1 }
 0x270   : > { %p752_p6 = por %p751_p4, %p750_p2 }
 0x272   : > { %p753_p8 = pnand %p752_p6, %p746_p0 }
 0x274   : > { %756 = shalt.err (!%p753_p8)
}
 0x275   : > { %s806_s29 = smov 128   ;;  %s807_s28 = smov 8  }
 0x276   : > { %612 = dma.vmem_to_hbm [thread:$0]  (%p932_p12), %s1009_s6, 256, %s1014_s10, %s404_s11, %s806_s29, %s806_s29, %s807_s28  }
 0x277 PF: > { %s432_s27 = sand.u32 1, %s787_s18   ;;  %p1078_p10 = scmp.ne.s32.totalorder %s1068_s25, 0 }
 0x278   : > { %p1079_p13 = scmp.ge.s32.totalorder %s799_s21, 2  ;;  %s433_s12 = scalar_lea.sflag [#allocation4], %s432_s27 }
 0x27a   : > { %p623_p3 = pnand %p1079_p13, %p1078_p10 }
 0x27c   : > { %782 = dma.done.wait (!%p623_p3), %s433_s12, 256  }
 0x27d   : > { %784 = vsyncadd (!%p623_p3), %s433_s12, 4294967040  ;;  %p19_p7 = scmp.ge.s32.totalorder %s894_s30, 4   ;;  %s1080_s18 = smov %s791_s19 }
 0x27e   : > { %s1081_s19 = smov %s795_s20  ;;  %s1082_s20 = smov %s928_s8 }
 0x27f   : > { %s1083_s21 = smov %s894_s30  ;;  %21 = sbr.rel (!%p19_p7) target bundleno = 6 (0x6), region = 89 }
 0x286   :  { %438 = vsyncpa [#allocation3], 1 }
 0x287   :  { %440 = vsyncpa [#allocation3 + $0x1], 1 }
 0x288   :  { %441 = vsyncpa [#allocation6], 1 }
 0x289   :  { %442 = vsyncpa [#allocation4], 1 }
 0x28a   :  { %444 = vsyncpa [#allocation4 + $0x1], 1 }

</bundles_post_ra>
